<compile_context>
chip_gen: v7x
topology: tpu7x:2x2x1
jax: 0.10.0
libtpu: 0.0.40
codegen_flags: <defaults>
</compile_context>

<pallas_src>
import functools

import jax
import jax.numpy as jnp
from jax.experimental import pallas as pl
from jax.experimental.pallas import tpu as pltpu

_NEG = -1e30  # padded-class bias: finite in f32, exp() -> 0, never wins the max()


def _round_up(x, m):
    return ((x + m - 1) // m) * m


def _tpu_vmem_capacity_bytes(default=64 << 20):
    # Conservative fallback (v7x per-TC budget) if the query is unavailable.
    try:
        return int(pltpu.get_tpu_info().vmem_capacity_bytes)
    except Exception:
        return default


_VMEM_CAP = _tpu_vmem_capacity_bytes()


def mlp_kernel(x_ref, w1_ref, b1_ref, w2_ref, b2_ref, o_ref):
    # x: (TB, D) f32 | w1: (D, H) bf16 | b1: (1, H) f32
    # w2: (H, Cp) bf16 | b2: (1, Cp) f32 | o: (TB, Cp) out_dtype
    # In-register downcast of x -> matmul dtype (no extra HBM pass in the wrapper).
    x = x_ref[...].astype(w1_ref.dtype)
    # Hidden layer: MXU matmul with f32 accumulation, bias + ReLU in f32
    # (f32 epilogue is safe on v5e which lacks a bf16 VPU).
    h = jnp.dot(x, w1_ref[...], preferred_element_type=jnp.float32) + b1_ref[...]
    h = jnp.maximum(h, 0.0)
    # Output layer: bf16 MXU inputs, f32 accumulation, f32 bias.
    logits = jnp.dot(h.astype(w2_ref.dtype), w2_ref[...],
                     preferred_element_type=jnp.float32) + b2_ref[...]
    # log_softmax over the lane axis; padded classes carry ~-1e30 bias so they do
    # not perturb max() and contribute exp()==0 to the normalizer.
    m = jnp.max(logits, axis=-1, keepdims=True)
    shifted = logits - m
    lse = jnp.log(jnp.sum(jnp.exp(shifted), axis=-1, keepdims=True))
    o_ref[...] = (shifted - lse).astype(o_ref.dtype)


def prepare_params(w1, b1, w2, b2, *, matmul_dtype=jnp.bfloat16):
    """One-time prep (outside the hot path): bf16 weights, lane-dense padded classes."""
    H = w1.shape[1]
    C = w2.shape[1]
    C_pad = max(128, _round_up(C, 128))
    w1c = jnp.asarray(w1, matmul_dtype)
    b1c = jnp.asarray(b1, jnp.float32).reshape(1, H)
    w2p = jnp.pad(jnp.asarray(w2, matmul_dtype), ((0, 0), (0, C_pad - C)))
    b2p = jnp.pad(jnp.asarray(b2, jnp.float32).reshape(1, C),
                  ((0, 0), (0, C_pad - C)), constant_values=_NEG)
    return (w1c, b1c, w2p, b2p)


def _choose_batch_tiling(B, block_b, min_grid_steps):
    # Bounded pad waste (< 8 rows per step) and >= min_grid_steps steps for
    # non-trivial batches so v7x can shard the batch axis across its 2 TCs.
    steps = max(1, pl.cdiv(B, block_b))
    if B > 8 * min_grid_steps:
        steps = max(steps, min_grid_steps)
    TB = _round_up(pl.cdiv(B, steps), 8)
    B_pad = _round_up(B, TB)
    return TB, B_pad


@functools.partial(
    jax.jit,
    static_argnames=("x_dim", "n_classes", "block_b", "min_grid_steps",
                     "unpad", "out_dtype"))
def mlp_forward(x, params, x_dim, n_classes, *, block_b=1024, min_grid_steps=2,
                unpad=True, out_dtype=jnp.float32):
    # mirrors torch: x.view(-1, x_dim**2) (row-major flatten of NCHW with C=1)
    w1, b1, w2, b2 = params
    d_in = x_dim * x_dim
    xf = x.reshape(-1, d_in)                  # free view; NO dtype cast here
    B = xf.shape[0]
    H = w1.shape[1]
    C_pad = w2.shape[1]

    TB, B_pad = _choose_batch_tiling(B, block_b, min_grid_steps)
    grid = (B_pad // TB,)
    xp = xf if B_pad == B else jnp.pad(xf, ((0, B_pad - B), (0, 0)))

    x_size = xp.dtype.itemsize
    mm_size = w1.dtype.itemsize
    out_size = jnp.dtype(out_dtype).itemsize

    # VMEM budget: double-buffered x/out tiles, single-buffered resident weights,
    # plus in-kernel f32/bf16 intermediates.
    vmem_bytes = (
        2 * TB * d_in * x_size                  # x tiles (double-buffered)
        + 2 * TB * C_pad * out_size             # out tiles (double-buffered)
        + d_in * H * mm_size + H * 4            # resident w1, b1 (single-buffered)
        + H * C_pad * mm_size + C_pad * 4       # resident w2, b2 (single-buffered)
        + TB * d_in * mm_size                   # bf16 copy of x tile
        + TB * H * (4 + mm_size)                # f32 hidden + bf16 downcast
        + 2 * TB * C_pad * 4                    # f32 logits / shifted
    )
    vmem_limit = int(min(vmem_bytes + (8 << 20), _VMEM_CAP - (16 << 20)))
    vmem_limit = max(vmem_limit, 16 << 20)

    cost = pl.CostEstimate(
        flops=2 * B_pad * (d_in * H + H * C_pad),
        transcendentals=B_pad * C_pad + B_pad,          # exp + log
        bytes_accessed=(B_pad * d_in * x_size
                        + d_in * H * mm_size + H * C_pad * mm_size
                        + H * 4 + C_pad * 4
                        + B_pad * C_pad * out_size),
    )

    out = pl.pallas_call(
        mlp_kernel,
        out_shape=jax.ShapeDtypeStruct((B_pad, C_pad), out_dtype),
        grid=grid,
        in_specs=[
            # x: streamed over batch (default double-buffered pipeline).
            pl.BlockSpec((TB, d_in), lambda i: (i, 0)),
            # Resident operands: constant index_map -> single buffer is enough.
            pl.BlockSpec((d_in, H), lambda i: (0, 0), pipeline_mode=pl.Buffered(1)),
            pl.BlockSpec((1, H), lambda i: (0, 0), pipeline_mode=pl.Buffered(1)),
            pl.BlockSpec((H, C_pad), lambda i: (0, 0), pipeline_mode=pl.Buffered(1)),
            pl.BlockSpec((1, C_pad), lambda i: (0, 0), pipeline_mode=pl.Buffered(1)),
        ],
        out_specs=pl.BlockSpec((TB, C_pad), lambda i: (i, 0)),
        compiler_params=pltpu.CompilerParams(
            dimension_semantics=("parallel",),
            vmem_limit_bytes=vmem_limit,
        ),
        cost_estimate=cost,
    )(xp, w1, b1, w2, b2)

    if unpad:
        return out[:B, :n_classes]
    # Padded (B_pad, C_pad) buffer; consumers must ignore rows >= B / cols >= n_classes.
    return out


def init_params(key, x_dim, hidden_size, n_classes):
    # Deterministic init matching nn.Linear's uniform(-1/sqrt(fan_in), 1/sqrt(fan_in)).
    d_in = x_dim * x_dim
    k1, k2, k3, k4 = jax.random.split(key, 4)
    lim1 = 1.0 / jnp.sqrt(jnp.float32(d_in))
    lim2 = 1.0 / jnp.sqrt(jnp.float32(hidden_size))
    w1 = jax.random.uniform(k1, (d_in, hidden_size), jnp.float32, -lim1, lim1)
    b1 = jax.random.uniform(k2, (1, hidden_size), jnp.float32, -lim1, lim1)
    w2 = jax.random.uniform(k3, (hidden_size, n_classes), jnp.float32, -lim2, lim2)
    b2 = jax.random.uniform(k4, (1, n_classes), jnp.float32, -lim2, lim2)
    return w1, b1, w2, b2


def mlp_reference(x, w1, b1, w2, b2, x_dim, matmul_dtype=jnp.float32):
    xf = x.reshape(-1, x_dim * x_dim).astype(jnp.float32)
    h = jnp.dot(xf.astype(matmul_dtype), w1.astype(matmul_dtype),
                preferred_element_type=jnp.float32) + b1.reshape(1, -1)
    h = jnp.maximum(h, 0.0)
    logits = jnp.dot(h.astype(matmul_dtype), w2.astype(matmul_dtype),
                     preferred_element_type=jnp.float32) + b2.reshape(1, -1)
    return jax.nn.log_softmax(logits, axis=-1)


if __name__ == "__main__":
    # Small shapes consistent with the module (hidden_layers=1, relu).
    B, x_dim, hidden_size, n_classes = 2, 16, 128, 10
    key = jax.random.PRNGKey(0)
    kx, kp = jax.random.split(key)
    x = jax.random.normal(kx, (B, 1, x_dim, x_dim), jnp.float32)  # NCHW
    w1, b1, w2, b2 = init_params(kp, x_dim, hidden_size, n_classes)

    # One-time weight prep (bf16 cast + class padding) outside the hot path.
    params = prepare_params(w1, b1, w2, b2)

    out = mlp_forward(x, params, x_dim, n_classes)
    out = jax.block_until_ready(out)
    assert out.shape == (B, n_classes)
    assert bool(jnp.all(jnp.isfinite(out)))

    # Reference with the same bf16-matmul / f32-accumulate precision policy.
    ref_bf16 = mlp_reference(x, w1, b1, w2, b2, x_dim, matmul_dtype=jnp.bfloat16)
    assert jnp.allclose(out, ref_bf16, atol=2e-3, rtol=2e-3)

    # Sanity check against the full-f32 reference (loose tol for bf16 matmul inputs).
    ref_f32 = mlp_reference(x, w1, b1, w2, b2, x_dim, matmul_dtype=jnp.float32)
    assert jnp.allclose(out, ref_f32, atol=5e-2, rtol=5e-2)

    # Awkward batch size exercises the multi-step grid + bounded tail padding.
    x2 = jax.random.normal(jax.random.PRNGKey(1), (50, 1, x_dim, x_dim), jnp.float32)
    out2 = jax.block_until_ready(mlp_forward(x2, params, x_dim, n_classes))
    ref2 = mlp_reference(x2, w1, b1, w2, b2, x_dim, matmul_dtype=jnp.float32)
    assert out2.shape == (50, n_classes)
    assert jnp.allclose(out2, ref2, atol=5e-2, rtol=5e-2)

    print("KERNEL_OK")
</pallas_src>

<mosaic_0001>
module attributes {stable_mosaic.version = 11 : i64} {
  func.func @mlp_kernel(%arg0: i32, %arg1: memref<8x256xf32, #tpu.memory_space<vmem>>, %arg2: memref<256x128xbf16, #tpu.memory_space<vmem>>, %arg3: memref<1x128xf32, #tpu.memory_space<vmem>>, %arg4: memref<128x128xbf16, #tpu.memory_space<vmem>>, %arg5: memref<1x128xf32, #tpu.memory_space<vmem>>, %arg6: memref<8x128xf32, #tpu.memory_space<vmem>>) attributes {dimension_semantics = [#tpu.dimension_semantics<parallel>], iteration_bounds = array<i64: 1>, scalar_prefetch = 0 : i64, scratch_operands = 0 : i64, tpu.core_type = #tpu.core_type<tc>, window_params = [{transform_indices = @transform_0, window_bounds = array<i64: 8, 256>}, {pipeline_mode = #tpu.pipeline_mode<synchronous>, transform_indices = @transform_1, window_bounds = array<i64: 256, 128>}, {pipeline_mode = #tpu.pipeline_mode<synchronous>, transform_indices = @transform_2, window_bounds = array<i64: 1, 128>}, {pipeline_mode = #tpu.pipeline_mode<synchronous>, transform_indices = @transform_3, window_bounds = array<i64: 128, 128>}, {pipeline_mode = #tpu.pipeline_mode<synchronous>, transform_indices = @transform_4, window_bounds = array<i64: 1, 128>}, {transform_indices = @transform_5, window_bounds = array<i64: 8, 128>}]} {
    %c0 = arith.constant 0 : index
    %c0_0 = arith.constant 0 : index
    %0 = vector.load %arg1[%c0, %c0_0] : memref<8x256xf32, #tpu.memory_space<vmem>>, vector<8x256xf32>
    %1 = arith.truncf %0 : vector<8x256xf32> to vector<8x256xbf16>
    %c0_1 = arith.constant 0 : index
    %c0_2 = arith.constant 0 : index
    %2 = vector.load %arg2[%c0_1, %c0_2] : memref<256x128xbf16, #tpu.memory_space<vmem>>, vector<256x128xbf16>
    %cst = arith.constant dense<0.000000e+00> : vector<8x128xf32>
    %3 = tpu.matmul %1, %2, %cst {dimension_numbers = #tpu.dot_dimension_numbers<[1], [0], [0], [1], [0, 0, 1, 1], [], []>} : vector<8x256xbf16>, vector<256x128xbf16>, vector<8x128xf32> -> vector<8x128xf32>
    %c0_3 = arith.constant 0 : index
    %c0_4 = arith.constant 0 : index
    %4 = vector.load %arg3[%c0_3, %c0_4] : memref<1x128xf32, #tpu.memory_space<vmem>>, vector<1x128xf32>
    %5 = vector.broadcast %4 : vector<1x128xf32> to vector<8x128xf32>
    %6 = arith.addf %3, %5 : vector<8x128xf32>
    %cst_5 = arith.constant 0.000000e+00 : f32
    %7 = vector.broadcast %cst_5 : f32 to vector<8x128xf32>
    %8 = arith.maximumf %6, %7 : vector<8x128xf32>
    %9 = arith.truncf %8 : vector<8x128xf32> to vector<8x128xbf16>
    %c0_6 = arith.constant 0 : index
    %c0_7 = arith.constant 0 : index
    %10 = vector.load %arg4[%c0_6, %c0_7] : memref<128x128xbf16, #tpu.memory_space<vmem>>, vector<128x128xbf16>
    %cst_8 = arith.constant dense<0.000000e+00> : vector<8x128xf32>
    %11 = tpu.matmul %9, %10, %cst_8 {dimension_numbers = #tpu.dot_dimension_numbers<[1], [0], [0], [1], [0, 0, 1, 1], [], []>} : vector<8x128xbf16>, vector<128x128xbf16>, vector<8x128xf32> -> vector<8x128xf32>
    %c0_9 = arith.constant 0 : index
    %c0_10 = arith.constant 0 : index
    %12 = vector.load %arg5[%c0_9, %c0_10] : memref<1x128xf32, #tpu.memory_space<vmem>>, vector<1x128xf32>
    %13 = vector.broadcast %12 : vector<1x128xf32> to vector<8x128xf32>
    %14 = arith.addf %11, %13 : vector<8x128xf32>
    %cst_11 = arith.constant dense<0xFF800000> : vector<8xf32>
    %15 = vector.multi_reduction <maximumf>, %14, %cst_11 [1] : vector<8x128xf32> to vector<8xf32>
    %16 = vector.shape_cast %15 : vector<8xf32> to vector<8x1xf32>
    %17 = vector.broadcast %16 : vector<8x1xf32> to vector<8x128xf32>
    %18 = arith.subf %14, %17 : vector<8x128xf32>
    %19 = math.exp %18 : vector<8x128xf32>
    %cst_12 = arith.constant dense<0.000000e+00> : vector<8xf32>
    %20 = vector.multi_reduction <add>, %19, %cst_12 [1] : vector<8x128xf32> to vector<8xf32>
    %21 = vector.shape_cast %20 : vector<8xf32> to vector<8x1xf32>
    %22 = math.log %21 : vector<8x1xf32>
    %23 = vector.broadcast %22 : vector<8x1xf32> to vector<8x128xf32>
    %24 = arith.subf %18, %23 : vector<8x128xf32>
    %c0_13 = arith.constant 0 : index
    %c0_14 = arith.constant 0 : index
    %25 = vector.load %arg6[%c0_13, %c0_14] : memref<8x128xf32, #tpu.memory_space<vmem>>, vector<8x128xf32>
    tpu.vector_store %arg6[%c0_13, %c0_14], %24 {strides = array<i32>} : memref<8x128xf32, #tpu.memory_space<vmem>>, vector<8x128xf32>,
    return
  }
  func.func @transform_0(%arg0: i32) -> (i32, i32) {
    %c0_i32 = arith.constant 0 : i32
    %c0_i32_0 = arith.constant 0 : i32
    return %arg0, %c0_i32 : i32, i32
  }
  func.func @transform_1(%arg0: i32) -> (i32, i32) {
    %c0_i32 = arith.constant 0 : i32
    %c0_i32_0 = arith.constant 0 : i32
    %c0_i32_1 = arith.constant 0 : i32
    return %c0_i32, %c0_i32_0 : i32, i32
  }
  func.func @transform_2(%arg0: i32) -> (i32, i32) {
    %c0_i32 = arith.constant 0 : i32
    %c0_i32_0 = arith.constant 0 : i32
    %c0_i32_1 = arith.constant 0 : i32
    return %c0_i32, %c0_i32_0 : i32, i32
  }
  func.func @transform_3(%arg0: i32) -> (i32, i32) {
    %c0_i32 = arith.constant 0 : i32
    %c0_i32_0 = arith.constant 0 : i32
    %c0_i32_1 = arith.constant 0 : i32
    return %c0_i32, %c0_i32_0 : i32, i32
  }
  func.func @transform_4(%arg0: i32) -> (i32, i32) {
    %c0_i32 = arith.constant 0 : i32
    %c0_i32_0 = arith.constant 0 : i32
    %c0_i32_1 = arith.constant 0 : i32
    return %c0_i32, %c0_i32_0 : i32, i32
  }
  func.func @transform_5(%arg0: i32) -> (i32, i32) {
    %c0_i32 = arith.constant 0 : i32
    %c0_i32_0 = arith.constant 0 : i32
    return %arg0, %c0_i32 : i32, i32
  }
}

</mosaic_0001>

<bundles_post_ra>
// kernel: mlp_forward.1
= control target key start
LH: loop header
LB: loop body
LE: loop exit
PB: predicated region body
PF: predicated region fallthrough
CT: control target
= control target key end

     0   :  { %10 = vsyncpa [#allocation3], 0  ;;  %s477_s18 = smov [#allocation2]   ;;  %s572_s0 = inlined_call_operand.vmem [shape: f32[8,256], index: 0, kind: input, shape index: {}]   ;;  %s573_s1 = inlined_call_operand.hbm [shape: bf16[256,128], index: 1, kind: input, shape index: {}]   ;;  %s574_s2 = inlined_call_operand.vmem [shape: f32[1,128], index: 2, kind: input, shape index: {}]   ;;  %s575_s3 = inlined_call_operand.vmem [shape: bf16[128,128], index: 3, kind: input, shape index: {}]   ;;  %s576_s4 = inlined_call_operand.vmem [shape: f32[1,128], index: 4, kind: input, shape index: {}]   ;;  %s577_s5 = inlined_call_operand.vmem [shape: f32[8,128], index: 5, kind: output, shape index: {}]  }
   0x1   :  { %s18_s19 = sshll.u32 %s477_s18, 4  ;;  %s453_s22 = scalar_lea.hbm %s573_s1, 2048  ;;  %s19_s19 = int_to_ptr.vmem [resolvable:$true] %s18_s19 }
   0x2   :  { %p454_p0 = scmp.ne.s32.totalorder %s573_s1, %s453_s22  ;;  %p457_p1 = scmp.lt.u32.totalorder %s453_s22, %s573_s1 }
   0x4   :  { %p459_p2 = pnand %p457_p1, %p454_p0 }
   0x6   :  { %462 = shalt.err (!%p459_p2)
}
   0x7   :  { %s463_s27 = scalar_lea.vmem %s19_s19, 2048  ;;  %p468_p4 = scmp.lt.s32.totalorder %s19_s19, %s19_s19 }
   0x8   :  { %p464_p3 = scmp.ne.s32.totalorder %s19_s19, %s463_s27  ;;  %p469_p5 = scmp.lt.s32.totalorder %s463_s27, %s463_s27 }
   0xa   :  { %p470_p6 = por %p469_p5, %p468_p4 }
   0xc   :  { %p471_p7 = pnand %p470_p6, %p464_p3 }
   0xe   :  { %474 = shalt.err (!%p471_p7)
}
   0xf   :  { %s478_s28 = smov 64   ;;  %s479_s29 = smov 4  }
  0x10   :  { %24 = dma.hbm_to_vmem [thread:$0]  %s573_s1, 2048, %s19_s19, [#allocation3], %s478_s28, %s478_s28, %s479_s29  }
  0x11   :  { %475 = dma.done.wait [#allocation3], 2048  }
  0x12   :  { %476 = vsyncadd [#allocation3], 4294965248  ;;  %v480_v0 = vmov 0.0   ;;  %v425_v1 = vld [vmem:[#allocation2 + $0x40] sm:$0xff]   ;;  %v427_v3 = vld [vmem:[#allocation2 + $0x48] sm:$0xff]   ;;  %vm481_vm0 = vmmov 0  }
  0x13   :  { %400 = vmatprep.subr.bf16.mxu1 %v480_v0  ;;  %v426_v2 = vld [vmem:[#allocation2] sm:$0xff]   ;;  %369 = vmatprep.subr.bf16.mxu0 %v425_v1  ;;  %v428_v4 = vld [vmem:[#allocation2 + $0x8] sm:$0xff]   ;;  %v429_v5 = vld [vmem:[#allocation2 + $0x50] sm:$0xff]  }
  0x14   :  { %370 = vmatpush3.bf16.msra.mxu0 %v426_v2  ;;  %v430_v6 = vld [vmem:[#allocation2 + $0x10] sm:$0xff]   ;;  %v431_v7 = vld [vmem:[#allocation2 + $0x58] sm:$0xff]   ;;  %v433_v9 = vld [vmem:[#allocation2 + $0x60] sm:$0xff]   ;;  %416 = vmatprep.mubr.msk.bf16.mxu1 %vm481_vm0, %v480_v0 }
  0x15   :  { %371 = vmatprep.subr.bf16.mxu0 %v427_v3  ;;  %v432_v8 = vld [vmem:[#allocation2 + $0x18] sm:$0xff]   ;;  %v434_v10 = vld [vmem:[#allocation2 + $0x20] sm:$0xff]   ;;  %v435_v11 = vld [vmem:[#allocation2 + $0x68] sm:$0xff]  }
  0x16   :  { %v36_v12 = vld [vmem:[%s572_s0 + $0x8] sm:$0xff]  ;;  %v441_v14 = vld [vmem:[%s575_s3] sm:$0xff]   ;;  %v437_v16 = vld [vmem:[#allocation2 + $0x70] sm:$0xff]  }
  0x17   :  { %v38_v13 = vpack.c.bf16 %v36_v12, %v36_v12  ;;  %v436_v15 = vld [vmem:[#allocation2 + $0x28] sm:$0xff]   ;;  %401 = vmatpush3.bf16.msra.mxu1 %v441_v14  ;;  %v438_v18 = vld [vmem:[#allocation2 + $0x30] sm:$0xff]   ;;  %v439_v19 = vld [vmem:[#allocation2 + $0x78] sm:$0xff]  }
  0x18   :  { %372 = vmatpush3.bf16.msra.mxu0 %v428_v4  ;;  %v442_v17 = vld [vmem:[%s575_s3 + $0x8] sm:$0xff]   ;;  %402 = vmatprep.subr.bf16.mxu1 %v480_v0  ;;  %v443_v20 = vld [vmem:[%s575_s3 + $0x10] sm:$0xff]   ;;  %v440_v21 = vld [vmem:[#allocation2 + $0x38] sm:$0xff]  }
  0x19   :  { %373 = vmatprep.subr.bf16.mxu0 %v429_v5  ;;  %206 = vmatprep.mubr.bf16.mxu0 %v38_v13  ;;  %v35_v22 = vld [vmem:[%s572_s0] sm:$0xff]  ;;  %v444_v23 = vld [vmem:[%s575_s3 + $0x18] sm:$0xff]   ;;  %v446_v26 = vld [vmem:[%s575_s3 + $0x28] sm:$0xff]  }
  0x1a   :  { %v37_v24 = vpack.c.bf16 %v35_v22, %v35_v22  ;;  %v445_v25 = vld [vmem:[%s575_s3 + $0x20] sm:$0xff]   ;;  %v447_v27 = vld [vmem:[%s575_s3 + $0x30] sm:$0xff]   ;;  %v448_v28 = vld [vmem:[%s575_s3 + $0x38] sm:$0xff]  }
  0x1b   :  { %403 = vmatpush3.bf16.msra.mxu1 %v442_v17  ;;  %v343_v30 = vld [vmem:[%s574_s2] ss:$0 sm:$0xff] }
  0x1c   :  { %374 = vmatpush3.bf16.msra.mxu0 %v430_v6  ;;  %404 = vmatprep.subr.bf16.mxu1 %v480_v0  ;;  %v360_v38 = vld [vmem:[%s576_s4] ss:$0 sm:$0xff] }
  0x1d   :  { %375 = vmatprep.subr.bf16.mxu0 %v431_v7 }
  0x1f   :  { %405 = vmatpush3.bf16.msra.mxu1 %v443_v20 }
  0x20   :  { %376 = vmatpush3.bf16.msra.mxu0 %v432_v8  ;;  %406 = vmatprep.subr.bf16.mxu1 %v480_v0 }
  0x21   :  { %377 = vmatprep.subr.bf16.mxu0 %v433_v9 }
  0x23   :  { %407 = vmatpush3.bf16.msra.mxu1 %v444_v23 }
  0x24   :  { %378 = vmatpush3.bf16.msra.mxu0 %v434_v10  ;;  %408 = vmatprep.subr.bf16.mxu1 %v480_v0 }
  0x25   :  { %379 = vmatprep.subr.bf16.mxu0 %v435_v11 }
  0x27   :  { %409 = vmatpush3.bf16.msra.mxu1 %v445_v25 }
  0x28   :  { %380 = vmatpush3.bf16.msra.mxu0 %v436_v15  ;;  %410 = vmatprep.subr.bf16.mxu1 %v480_v0 }
  0x29   :  { %381 = vmatprep.subr.bf16.mxu0 %v437_v16 }
  0x2b   :  { %411 = vmatpush3.bf16.msra.mxu1 %v446_v26 }
  0x2c   :  { %382 = vmatpush3.bf16.msra.mxu0 %v438_v18  ;;  %412 = vmatprep.subr.bf16.mxu1 %v480_v0 }
  0x2d   :  { %383 = vmatprep.subr.bf16.mxu0 %v439_v19 }
  0x2f   :  { %413 = vmatpush3.bf16.msra.mxu1 %v447_v27 }
  0x30   :  { %384 = vmatpush3.bf16.msra.mxu0 %v440_v21  ;;  %414 = vmatprep.subr.bf16.mxu1 %v480_v0 }
  0x33   :  { %207 = vmatmul.mubr.bf16.vlgmr.msra.gmra.mrb[0].mxu0 %v37_v24  ;;  %415 = vmatpush3.bf16.msra.mxu1 %v448_v28 }
 0x106   :  { %v385_v29 = vpop.f32.mrb[0].mxu0 }
 0x107   :  { %v386_v31 = vpop.f32.mrb[1].mxu0 }
 0x108   :  { %v387_v32 = vadd.f32 %v386_v31, %v385_v29  ;;  %v388_v33 = vpop.f32.mrb[2].mxu0 }
 0x109   :  { %v389_v34 = vpop.f32.mrb[3].mxu0 }
 0x10a   :  { %v209_v35 = vadd.f32 %v387_v32, %v343_v30 }
 0x10c   :  { %v214_v36 = vmax.f32 %v209_v35, 0.0 }
 0x10e   :  { %v215_v37 = vpack.c.bf16 %v214_v36, %v214_v36 }
 0x110   :  { %417 = vmatmul.mubr.bf16.vlgmr.msra.gmra.mrb[0].mxu1 %v215_v37 }
 0x1e3   :  { %v321_v39 = vpop.f32.mrb[0].mxu1 }
 0x1e4   :  { %v322_v40 = vadd.f32 %v360_v38, %v321_v39  ;;  %v418_v41 = vpop.f32.mrb[1].mxu1 }
 0x1e5   :  { %v324_v42 = vpop.f32.mrb[2].mxu1 }
 0x1e6   :  { %327 = vmax.xlane.f32.xlu0 %v322_v40  ;;  %v419_v43 = vpop.f32.mrb[3].mxu1 }
 0x273   :  { %v328_v44 = vpop.xlane.xlu0 %327 }
 0x274   :  { %v329_v45 = vsub.f32 %v322_v40, %v328_v44 }
 0x276   :  { %v330_v46 = vmul.f32 1.442695, %v329_v45 }
 0x278   :  { %449 = vpow2.f32 %v330_v46 }
 0x282   :  { %v450_v47 = vpop.eup %449 }
 0x283   :  { %332 = vadd.xlane.f32.xlu0 %v450_v47 }
 0x310   :  { %v333_v48 = vpop.xlane.xlu0 %332 }
 0x311   :  { %451 = vlog2.f32 %v333_v48 }
 0x31b   :  { %v452_v49 = vpop.eup %451 }
 0x31c   :  { %v335_v50 = vmul.f32 0.6931472, %v452_v49 }
 0x31e   :  { %v336_v51 = vsub.f32 %v329_v45, %v335_v50 }
 0x320   :  { %337 = vst [vmem:[%s577_s5] sm:$0xff] %v336_v51 }
 0x321   :  { %342 = vsyncpa [#allocation3], 1 }

</bundles_post_ra>
